<compile_context>
chip_gen: v6e
topology: v6e:2x2x1
jax: 0.10.0
libtpu: 0.0.40
codegen_flags: <defaults>
</compile_context>

<pallas_src>
import functools

import jax
import jax.numpy as jnp
from jax.experimental import pallas as pl
from jax.experimental.pallas import tpu as pltpu


def _round_up(x, m):
    return (x + m - 1) // m * m


def _vmem_budget_bytes():
    # Generation-aware VMEM limit: ~75% of physical VMEM (v5e/v6e: 128 MiB ->
    # 96 MiB; v7x: 64 MiB -> 48 MiB).  Conservative fallback if the query is
    # unavailable.
    try:
        cap = pltpu.get_tpu_info().vmem_capacity_bytes
    except Exception:
        cap = 64 * 1024 * 1024
    return min(int(cap * 3 // 4), 112 * 1024 * 1024)


# ----------------------------------------------------------------------------
# Kernel 1: fused synthetic-backbone GEMM (+bias +ReLU) and feature_to_embed
# GEMM.  The (tm, F) intermediate never leaves VMEM/vregs.
# ----------------------------------------------------------------------------
def _backbone_embed_single_kernel(x_ref, wbb_ref, bbb_ref, wfe_ref, bfe_ref,
                                  o_ref):
    # Single K block: accumulate in vregs, no scratch / pl.when structure.
    h = jnp.dot(x_ref[...], wbb_ref[...], preferred_element_type=jnp.float32)
    # TODO(synk): h is cast to bf16 before the second GEMM (perf tradeoff); a
    # strict parity reference would keep it f32.
    h = jnp.maximum(h + bbb_ref[...], 0.0).astype(jnp.bfloat16)
    y = jnp.dot(h, wfe_ref[...], preferred_element_type=jnp.float32)
    o_ref[...] = (y + bfe_ref[...]).astype(o_ref.dtype)


def _backbone_embed_multik_kernel(x_ref, wbb_ref, bbb_ref, wfe_ref, bfe_ref,
                                  o_ref, acc_ref):
    k = pl.program_id(1)

    @pl.when(k == 0)
    def _():
        acc_ref[...] = jnp.zeros_like(acc_ref)

    acc_ref[...] += jnp.dot(x_ref[...], wbb_ref[...],
                            preferred_element_type=jnp.float32)

    @pl.when(k == pl.num_programs(1) - 1)
    def _():
        h = jnp.maximum(acc_ref[...] + bbb_ref[...], 0.0).astype(jnp.bfloat16)
        y = jnp.dot(h, wfe_ref[...], preferred_element_type=jnp.float32)
        o_ref[...] = (y + bfe_ref[...]).astype(o_ref.dtype)


def _pick_backbone_tiles(M, Kp, F, D, budget):
    def est(tm, tk):
        return (2 * tm * tk * 2        # x blocks (bf16, double-buffered)
                + 2 * tk * F * 2       # backbone weight blocks
                + 2 * F * D * 2        # feature_to_embed weight (resident)
                + 2 * tm * D * 2       # output blocks
                + tm * F * 4           # f32 accumulator / intermediate
                + 2 * (F + D) * 4)     # biases

    if M < 8:
        tm_cands = [M]
    else:
        m_cap = _round_up(M, 8)
        if M >= 16:
            # Keep >= 2 programs on the parallel axis (dual-TC chips).
            m_cap = min(m_cap, _round_up(pl.cdiv(M, 2), 8))
        tm_cands = [t for t in (1024, 512, 256, 128, 64, 32, 16, 8) if t <= m_cap]
        if not tm_cands:
            tm_cands = [m_cap]

    single_k = Kp <= 2048
    if single_k:
        tk = Kp
        for tm in tm_cands:
            if est(tm, tk) <= budget:
                return tm, tk, True
        return tm_cands[-1], tk, True

    tk_cands = [t for t in (1024, 512, 256, 128) if Kp % t == 0]
    for tm in tm_cands:
        for tk in tk_cands:
            if est(tm, tk) <= budget:
                return tm, tk, False
    return tm_cands[-1], tk_cands[-1], False


def fused_backbone_embed(x, w_bb, b_bb, w_fe, b_fe):
    """x: (M, Kp) bf16, w_bb: (Kp, F) bf16, w_fe: (F, D) bf16 -> (M, D) bf16."""
    M, Kp = x.shape
    F = w_bb.shape[1]
    D = w_fe.shape[1]
    vmem_limit = _vmem_budget_bytes()
    tm, tk, single_k = _pick_backbone_tiles(M, Kp, F, D, vmem_limit - (4 << 20))

    b_bb = b_bb.astype(jnp.float32)
    b_fe = b_fe.astype(jnp.float32)

    if single_k:
        return pl.pallas_call(
            _backbone_embed_single_kernel,
            grid=(pl.cdiv(M, tm),),
            in_specs=[
                pl.BlockSpec((tm, Kp), lambda i: (i, 0)),   # patches
                pl.BlockSpec((Kp, F), lambda i: (0, 0)),    # backbone weight
                pl.BlockSpec((1, F), lambda i: (0, 0)),     # backbone bias
                pl.BlockSpec((F, D), lambda i: (0, 0)),     # feature_to_embed W
                pl.BlockSpec((1, D), lambda i: (0, 0)),     # feature_to_embed b
            ],
            out_specs=pl.BlockSpec((tm, D), lambda i: (i, 0)),
            out_shape=jax.ShapeDtypeStruct((M, D), jnp.bfloat16),
            compiler_params=pltpu.CompilerParams(
                dimension_semantics=("parallel",),
                vmem_limit_bytes=vmem_limit),
        )(x, w_bb, b_bb, w_fe, b_fe)

    grid = (pl.cdiv(M, tm), Kp // tk)
    return pl.pallas_call(
        _backbone_embed_multik_kernel,
        grid=grid,
        in_specs=[
            pl.BlockSpec((tm, tk), lambda i, k: (i, k)),
            pl.BlockSpec((tk, F), lambda i, k: (k, 0)),
            pl.BlockSpec((1, F), lambda i, k: (0, 0)),
            pl.BlockSpec((F, D), lambda i, k: (0, 0)),
            pl.BlockSpec((1, D), lambda i, k: (0, 0)),
        ],
        out_specs=pl.BlockSpec((tm, D), lambda i, k: (i, 0)),
        out_shape=jax.ShapeDtypeStruct((M, D), jnp.bfloat16),
        scratch_shapes=[pltpu.VMEM((tm, F), jnp.float32)],
        compiler_params=pltpu.CompilerParams(
            dimension_semantics=("parallel", "arbitrary"),
            vmem_limit_bytes=vmem_limit),
    )(x, w_bb, b_bb, w_fe, b_fe)


# ----------------------------------------------------------------------------
# Kernel 2: FeatureSelector (single-head class attention, algebraically folded)
# + LayerNorm(eps=1e-6) of the cls row + cls_head Linear.  Processes a block of
# batch rows per grid step with a fully batched epilogue.
# ----------------------------------------------------------------------------
def _head_kernel(x_ref, kq_ref, wvo_ref, bvo_ref, gamma_ref, beta_ref,
                 wh_ref, bh_ref, logits_ref, attn_ref, *, n_valid, mask_tokens):
    tb, n_pad, d = x_ref.shape
    x = x_ref[...]                                            # (tb, Np, D) bf16
    kq = kq_ref[...]                                          # (tb, 1, D) bf16 (pre-broadcast)

    # scores for the single cls query (flash-style batched einsum, no transpose)
    s = jnp.einsum("bqd,bnd->bqn", kq, x,
                   preferred_element_type=jnp.float32)        # (tb, 1, Np)
    if mask_tokens:
        tok = jax.lax.broadcasted_iota(jnp.int32, (tb, 1, n_pad), 2)
        s = jnp.where(tok < n_valid, s, -1e30)
    s = s - jnp.max(s, axis=-1, keepdims=True)
    e = jnp.exp(s)
    attn = e / jnp.sum(e, axis=-1, keepdims=True)             # exact (user-visible output)
    attn_ref[...] = attn[:, 0, :]                             # (tb, Np) lane-dense store

    # attention-weighted feature sum, then one batched epilogue for all rows.
    t = jnp.einsum("bqn,bnd->bqd", attn.astype(x.dtype), x,
                   preferred_element_type=jnp.float32)        # (tb, 1, D)
    t2 = t[:, 0, :].astype(jnp.bfloat16)                      # (tb, D)

    # folded value+output projection (single (tb,D)@(D,D) MXU matmul)
    x_cls = jnp.dot(t2, wvo_ref[...],
                    preferred_element_type=jnp.float32) + bvo_ref[...]   # (tb, D) f32

    # LayerNorm(eps=1e-6), vectorized over batch rows (f32 statistics)
    mu = jnp.mean(x_cls, axis=-1, keepdims=True)
    var = jnp.mean((x_cls - mu) ** 2, axis=-1, keepdims=True)
    nrm = (x_cls - mu) * jax.lax.rsqrt(var + 1e-6) * gamma_ref[...] + beta_ref[...]

    # cls head: single (tb,D)@(D,Lp) matmul + one unmasked store
    logits_ref[...] = (jnp.dot(nrm.astype(jnp.bfloat16), wh_ref[...],
                               preferred_element_type=jnp.float32) + bh_ref[...])


def _pick_head_tb(B, Np, D, budget):
    if B < 16:
        # Tiny batch: one block with block dims equal to the full array dims
        # (sublane-safe).  Dual-TC sharding only kicks in from B >= 16.
        return B
    tb = min(64, _round_up(pl.cdiv(B, 2), 8))   # multiple of 8, >= 2 programs
    while tb > 8 and 2 * (2 * tb * Np * D) > budget // 2:
        tb = max(8, tb // 2)
    return tb


def pallas_head(features, kq, wvo, bvo, gamma, beta, wh, bh, *, n_valid):
    """features: (B, Np, D) bf16 -> (logits (Bp, Lp) f32, attn (Bp, Np) f32)."""
    B, Np, D = features.shape
    L = wh.shape[1]
    Lp = _round_up(L, 128)                       # lane-dense logits slab
    vmem_limit = _vmem_budget_bytes()

    tb = _pick_head_tb(B, Np, D, vmem_limit)
    Bp = _round_up(B, tb)
    if Bp != B:
        features = jnp.pad(features, ((0, Bp - B), (0, 0), (0, 0)))

    wh_p = jnp.pad(wh, ((0, 0), (0, Lp - L))).astype(jnp.bfloat16)
    bh_p = jnp.pad(bh.astype(jnp.float32), ((0, 0), (0, Lp - L)))
    # Pre-broadcast kq so the kernel never re-emits a per-step broadcast; the
    # constant-index block is fetched once.
    kq_b = jnp.broadcast_to(kq.astype(jnp.bfloat16).reshape(1, 1, D), (tb, 1, D))

    const2 = lambda b: (0, 0)
    const3 = lambda b: (0, 0, 0)
    mask_tokens = Np != n_valid

    return pl.pallas_call(
        functools.partial(_head_kernel, n_valid=n_valid, mask_tokens=mask_tokens),
        grid=(Bp // tb,),
        in_specs=[
            pl.BlockSpec((tb, Np, D), lambda b: (b, 0, 0)),   # features
            pl.BlockSpec((tb, 1, D), const3),                 # scale * (wk @ q^T)
            pl.BlockSpec((D, D), const2),                     # wv @ wo (bf16)
            pl.BlockSpec((1, D), const2),                     # bv @ wo + bo (f32)
            pl.BlockSpec((1, D), const2),                     # LN gamma
            pl.BlockSpec((1, D), const2),                     # LN beta
            pl.BlockSpec((D, Lp), const2),                    # cls_head W (bf16, padded)
            pl.BlockSpec((1, Lp), const2),                    # cls_head b (f32, padded)
        ],
        out_specs=[
            pl.BlockSpec((tb, Lp), lambda b: (b, 0)),
            pl.BlockSpec((tb, Np), lambda b: (b, 0)),
        ],
        out_shape=(jax.ShapeDtypeStruct((Bp, Lp), jnp.float32),
                   jax.ShapeDtypeStruct((Bp, Np), jnp.float32)),
        compiler_params=pltpu.CompilerParams(
            dimension_semantics=("parallel",),
            vmem_limit_bytes=vmem_limit),
    )(features, kq_b,
      wvo.astype(jnp.bfloat16), bvo.astype(jnp.float32),
      gamma.astype(jnp.float32), beta.astype(jnp.float32), wh_p, bh_p)


# ----------------------------------------------------------------------------
# Full forward (glue reshapes / batch-independent algebra in plain JAX, hot
# paths in Pallas)
# ----------------------------------------------------------------------------
def docx_classifier_forward(image, params, patch):
    B, C, H, W = image.shape
    hn, wn = H // patch, W // patch
    N = hn * wn
    D = params["w_fe"].shape[1]
    L = params["wh"].shape[1]
    Cp = C * patch * patch

    # Patchify (== conv2d with kernel=stride=patch on NCHW input); zero-pad the
    # contraction dim to a 128-lane multiple (numerically a no-op).
    x = image.reshape(B, C, hn, patch, wn, patch)
    x = jnp.transpose(x, (0, 2, 4, 1, 3, 5)).reshape(B * N, Cp)
    Kp = _round_up(Cp, 128)
    x = jnp.pad(x, ((0, 0), (0, Kp - Cp))).astype(jnp.bfloat16)
    w_bb = jnp.pad(params["w_bb"], ((0, Kp - Cp), (0, 0))).astype(jnp.bfloat16)

    # Fused synthetic backbone + feature_to_embed -> (B*N, D) bf16.
    feats = fused_backbone_embed(
        x, w_bb, params["b_bb"],
        params["w_fe"].astype(jnp.bfloat16), params["b_fe"])
    feats = feats.reshape(B, N, D)

    # Pad the token axis so scores / attention weights are lane dense.
    Np = _round_up(N, 128)
    feats = jnp.pad(feats, ((0, 0), (0, Np - N), (0, 0)))

    # Hoist batch-independent class-attention algebra out of the kernel.
    q = params["cls_token"].reshape(1, D) @ params["wq"] + params["bq"]   # (1, D)
    kq = (q @ params["wk"].T) * (float(D) ** -0.5)                        # (1, D)
    # (q . bk) adds the same constant to every score -> cancels in softmax.
    wvo = params["wv"] @ params["wo"]                                     # (D, D)
    bvo = params["bv"] @ params["wo"] + params["bo"]                      # (1, D)

    logits_pad, attn_pad = pallas_head(
        feats, kq, wvo, bvo, params["gamma"], params["beta"],
        params["wh"], params["bh"], n_valid=N)

    logits = logits_pad[:B, :L]
    feature_weights = attn_pad[:B, :N][:, None, :]
    return logits, feature_weights


def init_params(key, *, in_ch, patch, feature_dim, embed_dim, num_labels):
    ks = jax.random.split(key, 9)
    s = 0.02
    cp = in_ch * patch * patch
    f32 = jnp.float32
    return {
        # synthetic patchify backbone (stands in for ResNet50/ConvNeXt features)
        "w_bb": s * jax.random.normal(ks[0], (cp, feature_dim), f32),
        "b_bb": jnp.zeros((1, feature_dim), f32),
        # feature_to_embed: Linear(feature_dim -> cls_embed_dim)
        "w_fe": s * jax.random.normal(ks[1], (feature_dim, embed_dim), f32),
        "b_fe": jnp.zeros((1, embed_dim), f32),
        # cls token (nn.Parameter(torch.zeros(...)))
        "cls_token": jnp.zeros((1, 1, embed_dim), f32),
        # FeatureSelector (single-head class attention)
        "wq": s * jax.random.normal(ks[2], (embed_dim, embed_dim), f32),
        "bq": s * jax.random.normal(ks[3], (1, embed_dim), f32),
        "wk": s * jax.random.normal(ks[4], (embed_dim, embed_dim), f32),
        "bk": s * jax.random.normal(ks[5], (1, embed_dim), f32),  # cancels in softmax
        "wv": s * jax.random.normal(ks[6], (embed_dim, embed_dim), f32),
        "bv": jnp.zeros((1, embed_dim), f32),
        "wo": s * jax.random.normal(ks[7], (embed_dim, embed_dim), f32),
        "bo": jnp.zeros((1, embed_dim), f32),
        # cls_norm (LayerNorm eps=1e-6) + cls_head
        "gamma": jnp.ones((1, embed_dim), f32),
        "beta": jnp.zeros((1, embed_dim), f32),
        "wh": s * jax.random.normal(ks[8], (embed_dim, num_labels), f32),
        "bh": jnp.zeros((1, num_labels), f32),
    }


if __name__ == "__main__":
    B, C, H, W = 2, 3, 16, 16
    PATCH = 4
    FEATURE_DIM = 256     # synthetic backbone output channels
    EMBED_DIM = 128       # cls_embed_dim (kept a 128-lane multiple)
    NUM_LABELS = 16

    key = jax.random.PRNGKey(0)
    k_img, k_par = jax.random.split(key)
    image = jax.random.normal(k_img, (B, C, H, W), jnp.float32)
    params = init_params(k_par, in_ch=C, patch=PATCH, feature_dim=FEATURE_DIM,
                         embed_dim=EMBED_DIM, num_labels=NUM_LABELS)

    fwd = jax.jit(functools.partial(docx_classifier_forward, patch=PATCH))
    logits, feature_weights = fwd(image, params)
    jax.block_until_ready((logits, feature_weights))

    n_tokens = (H // PATCH) * (W // PATCH)
    assert logits.shape == (B, NUM_LABELS), logits.shape
    assert feature_weights.shape == (B, 1, n_tokens), feature_weights.shape
    assert bool(jnp.all(jnp.isfinite(logits)))
    assert bool(jnp.all(jnp.isfinite(feature_weights)))
    print("KERNEL_OK")
</pallas_src>

<mosaic_0001>
module attributes {stable_mosaic.version = 11 : i64} {
  func.func @_backbone_embed_single_kernel(%arg0: i32, %arg1: memref<16x128xbf16, #tpu.memory_space<vmem>>, %arg2: memref<128x256xbf16, #tpu.memory_space<vmem>>, %arg3: memref<1x256xf32, #tpu.memory_space<vmem>>, %arg4: memref<256x128xbf16, #tpu.memory_space<vmem>>, %arg5: memref<1x128xf32, #tpu.memory_space<vmem>>, %arg6: memref<16x128xbf16, #tpu.memory_space<vmem>>) attributes {dimension_semantics = [#tpu.dimension_semantics<parallel>], iteration_bounds = array<i64: 2>, scalar_prefetch = 0 : i64, scratch_operands = 0 : i64, tpu.core_type = #tpu.core_type<tc>, window_params = [{transform_indices = @transform_0, window_bounds = array<i64: 16, 128>}, {pipeline_mode = #tpu.pipeline_mode<synchronous>, transform_indices = @transform_1, window_bounds = array<i64: 128, 256>}, {pipeline_mode = #tpu.pipeline_mode<synchronous>, transform_indices = @transform_2, window_bounds = array<i64: 1, 256>}, {pipeline_mode = #tpu.pipeline_mode<synchronous>, transform_indices = @transform_3, window_bounds = array<i64: 256, 128>}, {pipeline_mode = #tpu.pipeline_mode<synchronous>, transform_indices = @transform_4, window_bounds = array<i64: 1, 128>}, {transform_indices = @transform_5, window_bounds = array<i64: 16, 128>}]} {
    %c0 = arith.constant 0 : index
    %c0_0 = arith.constant 0 : index
    %0 = vector.load %arg1[%c0, %c0_0] : memref<16x128xbf16, #tpu.memory_space<vmem>>, vector<16x128xbf16>
    %c0_1 = arith.constant 0 : index
    %c0_2 = arith.constant 0 : index
    %1 = vector.load %arg2[%c0_1, %c0_2] : memref<128x256xbf16, #tpu.memory_space<vmem>>, vector<128x256xbf16>
    %cst = arith.constant dense<0.000000e+00> : vector<16x256xf32>
    %2 = tpu.matmul %0, %1, %cst {dimension_numbers = #tpu.dot_dimension_numbers<[1], [0], [0], [1], [0, 0, 1, 1], [], []>} : vector<16x128xbf16>, vector<128x256xbf16>, vector<16x256xf32> -> vector<16x256xf32>
    %c0_3 = arith.constant 0 : index
    %c0_4 = arith.constant 0 : index
    %3 = vector.load %arg3[%c0_3, %c0_4] : memref<1x256xf32, #tpu.memory_space<vmem>>, vector<1x256xf32>
    %4 = vector.broadcast %3 : vector<1x256xf32> to vector<16x256xf32>
    %5 = arith.addf %2, %4 : vector<16x256xf32>
    %cst_5 = arith.constant 0.000000e+00 : f32
    %6 = vector.broadcast %cst_5 : f32 to vector<16x256xf32>
    %7 = arith.maximumf %5, %6 : vector<16x256xf32>
    %8 = arith.truncf %7 : vector<16x256xf32> to vector<16x256xbf16>
    %c0_6 = arith.constant 0 : index
    %c0_7 = arith.constant 0 : index
    %9 = vector.load %arg4[%c0_6, %c0_7] : memref<256x128xbf16, #tpu.memory_space<vmem>>, vector<256x128xbf16>
    %cst_8 = arith.constant dense<0.000000e+00> : vector<16x128xf32>
    %10 = tpu.matmul %8, %9, %cst_8 {dimension_numbers = #tpu.dot_dimension_numbers<[1], [0], [0], [1], [0, 0, 1, 1], [], []>} : vector<16x256xbf16>, vector<256x128xbf16>, vector<16x128xf32> -> vector<16x128xf32>
    %c0_9 = arith.constant 0 : index
    %c0_10 = arith.constant 0 : index
    %11 = vector.load %arg5[%c0_9, %c0_10] : memref<1x128xf32, #tpu.memory_space<vmem>>, vector<1x128xf32>
    %12 = vector.broadcast %11 : vector<1x128xf32> to vector<16x128xf32>
    %13 = arith.addf %10, %12 : vector<16x128xf32>
    %14 = arith.truncf %13 : vector<16x128xf32> to vector<16x128xbf16>
    %c0_11 = arith.constant 0 : index
    %c0_12 = arith.constant 0 : index
    %15 = vector.load %arg6[%c0_11, %c0_12] : memref<16x128xbf16, #tpu.memory_space<vmem>>, vector<16x128xbf16>
    tpu.vector_store %arg6[%c0_11, %c0_12], %14 {strides = array<i32>} : memref<16x128xbf16, #tpu.memory_space<vmem>>, vector<16x128xbf16>,
    return
  }
  func.func @transform_0(%arg0: i32) -> (i32, i32) {
    %c0_i32 = arith.constant 0 : i32
    %c0_i32_0 = arith.constant 0 : i32
    return %arg0, %c0_i32 : i32, i32
  }
  func.func @transform_1(%arg0: i32) -> (i32, i32) {
    %c0_i32 = arith.constant 0 : i32
    %c0_i32_0 = arith.constant 0 : i32
    %c0_i32_1 = arith.constant 0 : i32
    return %c0_i32, %c0_i32_0 : i32, i32
  }
  func.func @transform_2(%arg0: i32) -> (i32, i32) {
    %c0_i32 = arith.constant 0 : i32
    %c0_i32_0 = arith.constant 0 : i32
    %c0_i32_1 = arith.constant 0 : i32
    return %c0_i32, %c0_i32_0 : i32, i32
  }
  func.func @transform_3(%arg0: i32) -> (i32, i32) {
    %c0_i32 = arith.constant 0 : i32
    %c0_i32_0 = arith.constant 0 : i32
    %c0_i32_1 = arith.constant 0 : i32
    return %c0_i32, %c0_i32_0 : i32, i32
  }
  func.func @transform_4(%arg0: i32) -> (i32, i32) {
    %c0_i32 = arith.constant 0 : i32
    %c0_i32_0 = arith.constant 0 : i32
    %c0_i32_1 = arith.constant 0 : i32
    return %c0_i32, %c0_i32_0 : i32, i32
  }
  func.func @transform_5(%arg0: i32) -> (i32, i32) {
    %c0_i32 = arith.constant 0 : i32
    %c0_i32_0 = arith.constant 0 : i32
    return %arg0, %c0_i32 : i32, i32
  }
}

module attributes {stable_mosaic.version = 11 : i64} {
  func.func @_head_kernel(%arg0: i32, %arg1: memref<2x128x128xbf16, #tpu.memory_space<vmem>>, %arg2: memref<2x1x128xbf16, #tpu.memory_space<vmem>>, %arg3: memref<128x128xbf16, #tpu.memory_space<vmem>>, %arg4: memref<1x128xf32, #tpu.memory_space<vmem>>, %arg5: memref<1x128xf32, #tpu.memory_space<vmem>>, %arg6: memref<1x128xf32, #tpu.memory_space<vmem>>, %arg7: memref<128x128xbf16, #tpu.memory_space<vmem>>, %arg8: memref<1x128xf32, #tpu.memory_space<vmem>>, %arg9: memref<2x128xf32, #tpu.memory_space<vmem>>, %arg10: memref<2x128xf32, #tpu.memory_space<vmem>>) attributes {dimension_semantics = [#tpu.dimension_semantics<parallel>], iteration_bounds = array<i64: 1>, scalar_prefetch = 0 : i64, scratch_operands = 0 : i64, tpu.core_type = #tpu.core_type<tc>, window_params = [{transform_indices = @transform_0, window_bounds = array<i64: 2, 128, 128>}, {pipeline_mode = #tpu.pipeline_mode<synchronous>, transform_indices = @transform_1, window_bounds = array<i64: 2, 1, 128>}, {pipeline_mode = #tpu.pipeline_mode<synchronous>, transform_indices = @transform_2, window_bounds = array<i64: 128, 128>}, {pipeline_mode = #tpu.pipeline_mode<synchronous>, transform_indices = @transform_3, window_bounds = array<i64: 1, 128>}, {pipeline_mode = #tpu.pipeline_mode<synchronous>, transform_indices = @transform_4, window_bounds = array<i64: 1, 128>}, {pipeline_mode = #tpu.pipeline_mode<synchronous>, transform_indices = @transform_5, window_bounds = array<i64: 1, 128>}, {pipeline_mode = #tpu.pipeline_mode<synchronous>, transform_indices = @transform_6, window_bounds = array<i64: 128, 128>}, {pipeline_mode = #tpu.pipeline_mode<synchronous>, transform_indices = @transform_7, window_bounds = array<i64: 1, 128>}, {transform_indices = @transform_8, window_bounds = array<i64: 2, 128>}, {transform_indices = @transform_9, window_bounds = array<i64: 2, 128>}]} {
    %c0 = arith.constant 0 : index
    %c0_0 = arith.constant 0 : index
    %c0_1 = arith.constant 0 : index
    %0 = vector.load %arg1[%c0, %c0_0, %c0_1] : memref<2x128x128xbf16, #tpu.memory_space<vmem>>, vector<2x128x128xbf16>
    %c0_2 = arith.constant 0 : index
    %c0_3 = arith.constant 0 : index
    %c0_4 = arith.constant 0 : index
    %1 = vector.load %arg2[%c0_2, %c0_3, %c0_4] : memref<2x1x128xbf16, #tpu.memory_space<vmem>>, vector<2x1x128xbf16>
    "tpu.trace_start"() <{level = 10 : i32, message = "bqd,bnd->bqn"}> : () -> ()
    %cst = arith.constant dense<0.000000e+00> : vector<2x1x128xf32>
    %2 = tpu.matmul %1, %0, %cst {dimension_numbers = #tpu.dot_dimension_numbers<[2], [2], [1], [1], [0, 0, 0, 1, 1, 1], [0], [0]>} : vector<2x1x128xbf16>, vector<2x128x128xbf16>, vector<2x1x128xf32> -> vector<2x1x128xf32>
    "tpu.trace_stop"() : () -> ()
    %3 = tpu.iota {dimensions = array<i32: 2>} : vector<2x1x128xi32>
    %c16_i32 = arith.constant 16 : i32
    %4 = vector.broadcast %c16_i32 : i32 to vector<2x1x128xi32>
    %5 = arith.cmpi slt, %3, %4 : vector<2x1x128xi32>
    %cst_5 = arith.constant -1.000000e+30 : f32
    %6 = vector.broadcast %cst_5 : f32 to vector<2x1x128xf32>
    %7 = arith.select %5, %2, %6 : vector<2x1x128xi1>, vector<2x1x128xf32>
    %cst_6 = arith.constant dense<0xFF800000> : vector<2x1xf32>
    %8 = vector.multi_reduction <maximumf>, %7, %cst_6 [2] : vector<2x1x128xf32> to vector<2x1xf32>
    %9 = vector.shape_cast %8 : vector<2x1xf32> to vector<2x1x1xf32>
    %10 = vector.broadcast %9 : vector<2x1x1xf32> to vector<2x1x128xf32>
    %11 = arith.subf %7, %10 : vector<2x1x128xf32>
    %12 = math.exp %11 : vector<2x1x128xf32>
    %cst_7 = arith.constant dense<0.000000e+00> : vector<2x1xf32>
    %13 = vector.multi_reduction <add>, %12, %cst_7 [2] : vector<2x1x128xf32> to vector<2x1xf32>
    %14 = vector.shape_cast %13 : vector<2x1xf32> to vector<2x1x1xf32>
    %15 = vector.broadcast %14 : vector<2x1x1xf32> to vector<2x1x128xf32>
    %16 = arith.divf %12, %15 : vector<2x1x128xf32>
    %17 = vector.shape_cast %16 : vector<2x1x128xf32> to vector<2x128xf32>
    %c0_8 = arith.constant 0 : index
    %c0_9 = arith.constant 0 : index
    %18 = vector.load %arg10[%c0_8, %c0_9] : memref<2x128xf32, #tpu.memory_space<vmem>>, vector<2x128xf32>
    tpu.vector_store %arg10[%c0_8, %c0_9], %17 {strides = array<i32>} : memref<2x128xf32, #tpu.memory_space<vmem>>, vector<2x128xf32>,
    %19 = arith.truncf %16 : vector<2x1x128xf32> to vector<2x1x128xbf16>
    "tpu.trace_start"() <{level = 10 : i32, message = "bqn,bnd->bqd"}> : () -> ()
    %cst_10 = arith.constant dense<0.000000e+00> : vector<2x1x128xf32>
    %20 = tpu.matmul %19, %0, %cst_10 {dimension_numbers = #tpu.dot_dimension_numbers<[2], [1], [1], [2], [0, 0, 0, 1, 1, 2], [0], [0]>} : vector<2x1x128xbf16>, vector<2x128x128xbf16>, vector<2x1x128xf32> -> vector<2x1x128xf32>
    "tpu.trace_stop"() : () -> ()
    %21 = vector.shape_cast %20 : vector<2x1x128xf32> to vector<2x128xf32>
    %22 = arith.truncf %21 : vector<2x128xf32> to vector<2x128xbf16>
    %c0_11 = arith.constant 0 : index
    %c0_12 = arith.constant 0 : index
    %23 = vector.load %arg3[%c0_11, %c0_12] : memref<128x128xbf16, #tpu.memory_space<vmem>>, vector<128x128xbf16>
    %cst_13 = arith.constant dense<0.000000e+00> : vector<2x128xf32>
    %24 = tpu.matmul %22, %23, %cst_13 {dimension_numbers = #tpu.dot_dimension_numbers<[1], [0], [0], [1], [0, 0, 1, 1], [], []>} : vector<2x128xbf16>, vector<128x128xbf16>, vector<2x128xf32> -> vector<2x128xf32>
    %c0_14 = arith.constant 0 : index
    %c0_15 = arith.constant 0 : index
    %25 = vector.load %arg4[%c0_14, %c0_15] : memref<1x128xf32, #tpu.memory_space<vmem>>, vector<1x128xf32>
    %26 = vector.broadcast %25 : vector<1x128xf32> to vector<2x128xf32>
    %27 = arith.addf %24, %26 : vector<2x128xf32>
    %cst_16 = arith.constant dense<0.000000e+00> : vector<2xf32>
    %28 = vector.multi_reduction <add>, %27, %cst_16 [1] : vector<2x128xf32> to vector<2xf32>
    %29 = vector.shape_cast %28 : vector<2xf32> to vector<2x1xf32>
    %cst_17 = arith.constant 1.280000e+02 : f32
    %30 = vector.broadcast %cst_17 : f32 to vector<2x1xf32>
    %31 = arith.divf %29, %30 : vector<2x1xf32>
    %32 = vector.broadcast %31 : vector<2x1xf32> to vector<2x128xf32>
    %33 = arith.subf %27, %32 : vector<2x128xf32>
    %34 = arith.mulf %33, %33 : vector<2x128xf32>
    %cst_18 = arith.constant dense<0.000000e+00> : vector<2xf32>
    %35 = vector.multi_reduction <add>, %34, %cst_18 [1] : vector<2x128xf32> to vector<2xf32>
    %36 = vector.shape_cast %35 : vector<2xf32> to vector<2x1xf32>
    %cst_19 = arith.constant 1.280000e+02 : f32
    %37 = vector.broadcast %cst_19 : f32 to vector<2x1xf32>
    %38 = arith.divf %36, %37 : vector<2x1xf32>
    %39 = vector.broadcast %31 : vector<2x1xf32> to vector<2x128xf32>
    %40 = arith.subf %27, %39 : vector<2x128xf32>
    %cst_20 = arith.constant 9.99999997E-7 : f32
    %41 = vector.broadcast %cst_20 : f32 to vector<2x1xf32>
    %42 = arith.addf %38, %41 : vector<2x1xf32>
    %43 = math.rsqrt %42 : vector<2x1xf32>
    %44 = vector.broadcast %43 : vector<2x1xf32> to vector<2x128xf32>
    %45 = arith.mulf %40, %44 : vector<2x128xf32>
    %c0_21 = arith.constant 0 : index
    %c0_22 = arith.constant 0 : index
    %46 = vector.load %arg5[%c0_21, %c0_22] : memref<1x128xf32, #tpu.memory_space<vmem>>, vector<1x128xf32>
    %47 = vector.broadcast %46 : vector<1x128xf32> to vector<2x128xf32>
    %48 = arith.mulf %45, %47 : vector<2x128xf32>
    %c0_23 = arith.constant 0 : index
    %c0_24 = arith.constant 0 : index
    %49 = vector.load %arg6[%c0_23, %c0_24] : memref<1x128xf32, #tpu.memory_space<vmem>>, vector<1x128xf32>
    %50 = vector.broadcast %49 : vector<1x128xf32> to vector<2x128xf32>
    %51 = arith.addf %48, %50 : vector<2x128xf32>
    %52 = arith.truncf %51 : vector<2x128xf32> to vector<2x128xbf16>
    %c0_25 = arith.constant 0 : index
    %c0_26 = arith.constant 0 : index
    %53 = vector.load %arg7[%c0_25, %c0_26] : memref<128x128xbf16, #tpu.memory_space<vmem>>, vector<128x128xbf16>
    %cst_27 = arith.constant dense<0.000000e+00> : vector<2x128xf32>
    %54 = tpu.matmul %52, %53, %cst_27 {dimension_numbers = #tpu.dot_dimension_numbers<[1], [0], [0], [1], [0, 0, 1, 1], [], []>} : vector<2x128xbf16>, vector<128x128xbf16>, vector<2x128xf32> -> vector<2x128xf32>
    %c0_28 = arith.constant 0 : index
    %c0_29 = arith.constant 0 : index
    %55 = vector.load %arg8[%c0_28, %c0_29] : memref<1x128xf32, #tpu.memory_space<vmem>>, vector<1x128xf32>
    %56 = vector.broadcast %55 : vector<1x128xf32> to vector<2x128xf32>
    %57 = arith.addf %54, %56 : vector<2x128xf32>
    %c0_30 = arith.constant 0 : index
    %c0_31 = arith.constant 0 : index
    %58 = vector.load %arg9[%c0_30, %c0_31] : memref<2x128xf32, #tpu.memory_space<vmem>>, vector<2x128xf32>
    tpu.vector_store %arg9[%c0_30, %c0_31], %57 {strides = array<i32>} : memref<2x128xf32, #tpu.memory_space<vmem>>, vector<2x128xf32>,
    return
  }
  func.func @transform_0(%arg0: i32) -> (i32, i32, i32) {
    %c0_i32 = arith.constant 0 : i32
    %c0_i32_0 = arith.constant 0 : i32
    %c0_i32_1 = arith.constant 0 : i32
    return %arg0, %c0_i32, %c0_i32_0 : i32, i32, i32
  }
  func.func @transform_1(%arg0: i32) -> (i32, i32, i32) {
    %c0_i32 = arith.constant 0 : i32
    %c0_i32_0 = arith.constant 0 : i32
    %c0_i32_1 = arith.constant 0 : i32
    %c0_i32_2 = arith.constant 0 : i32
    return %c0_i32, %c0_i32_0, %c0_i32_1 : i32, i32, i32
  }
  func.func @transform_2(%arg0: i32) -> (i32, i32) {
    %c0_i32 = arith.constant 0 : i32
    %c0_i32_0 = arith.constant 0 : i32
    %c0_i32_1 = arith.constant 0 : i32
    return %c0_i32, %c0_i32_0 : i32, i32
  }
  func.func @transform_3(%arg0: i32) -> (i32, i32) {
    %c0_i32 = arith.constant 0 : i32
    %c0_i32_0 = arith.constant 0 : i32
    %c0_i32_1 = arith.constant 0 : i32
    return %c0_i32, %c0_i32_0 : i32, i32
  }
  func.func @transform_4(%arg0: i32) -> (i32, i32) {
    %c0_i32 = arith.constant 0 : i32
    %c0_i32_0 = arith.constant 0 : i32
    %c0_i32_1 = arith.constant 0 : i32
    return %c0_i32, %c0_i32_0 : i32, i32
  }
  func.func @transform_5(%arg0: i32) -> (i32, i32) {
    %c0_i32 = arith.constant 0 : i32
    %c0_i32_0 = arith.constant 0 : i32
    %c0_i32_1 = arith.constant 0 : i32
    return %c0_i32, %c0_i32_0 : i32, i32
  }
  func.func @transform_6(%arg0: i32) -> (i32, i32) {
    %c0_i32 = arith.constant 0 : i32
    %c0_i32_0 = arith.constant 0 : i32
    %c0_i32_1 = arith.constant 0 : i32
    return %c0_i32, %c0_i32_0 : i32, i32
  }
  func.func @transform_7(%arg0: i32) -> (i32, i32) {
    %c0_i32 = arith.constant 0 : i32
    %c0_i32_0 = arith.constant 0 : i32
    %c0_i32_1 = arith.constant 0 : i32
    return %c0_i32, %c0_i32_0 : i32, i32
  }
  func.func @transform_8(%arg0: i32) -> (i32, i32) {
    %c0_i32 = arith.constant 0 : i32
    %c0_i32_0 = arith.constant 0 : i32
    return %arg0, %c0_i32 : i32, i32
  }
  func.func @transform_9(%arg0: i32) -> (i32, i32) {
    %c0_i32 = arith.constant 0 : i32
    %c0_i32_0 = arith.constant 0 : i32
    return %arg0, %c0_i32 : i32, i32
  }
}

</mosaic_0001>

<bundles_post_ra>
// kernel: docx_classifier_forward.2
= control target key start
LH: loop header
LB: loop body
LE: loop exit
PB: predicated region body
PF: predicated region fallthrough
CT: control target
= control target key end

     0   :  { %s801_s18 = smov 0   ;;  %s930_s0 = inlined_call_operand.vmem [shape: bf16[32,128], index: 0, kind: input, shape index: {}]   ;;  %s931_s1 = inlined_call_operand.vmem [shape: bf16[128,256], index: 1, kind: input, shape index: {}]   ;;  %s932_s2 = inlined_call_operand.vmem [shape: f32[1,256], index: 2, kind: input, shape index: {}]   ;;  %s933_s3 = inlined_call_operand.vmem [shape: bf16[256,128], index: 3, kind: input, shape index: {}]   ;;  %s934_s4 = inlined_call_operand.vmem [shape: f32[1,128], index: 4, kind: input, shape index: {}]   ;;  %s935_s5 = inlined_call_operand.vmem [shape: bf16[32,128], index: 5, kind: output, shape index: {}]  }
   0x1 LB: > { %s636_s19 = sadd.s32 4294967295, %s768_s18   ;;  %p640_p0 = scmp.ge.s32.totalorder %s768_s18, 1  ;;  %s768_s18 = sphi %s801_s18, %s15_s18  }
   0x2   : > { %p188_p1 = scmp.lt.s32.totalorder %s768_s18, 3 }
   0x4   : > { %p189_p2 = pnand %p640_p0, %p188_p1 }
   0x5   : > { %s641_s22 = sshll.u32 (!%p189_p2), %s636_s19, 1 }
   0x6   : > { %192 = sbr.rel (%p189_p2) target bundleno = 456 (0x1c8), region = 40  ;;  %p217_p3 = scmp.lt.s32.totalorder (!%p189_p2), %s641_s22, 3 }
   0xb   : > { %v721_v0 = vld [vmem:[%s931_s1 + $0x74] ss:$8 sps:$4 sm:$0xff]   ;;  %v723_v1 = vld [vmem:[%s931_s1 + $0x70] ss:$8 sps:$4 sm:$0xff]   ;;  %v770_v2 = vmov 0   ;;  %s937_s22 = smov (!%p217_p3, %s641_s22), 3  ;;  %v249_v34 = vlaneseq }
   0xc   : > { %377 = vmatprep.mubr.bf16.mxu0 %v770_v2  ;;  %345 = vmatprep.subr.bf16.mxu0 %v721_v0  ;;  %v724_v3 = vld [vmem:[%s931_s1 + $0x64] ss:$8 sps:$4 sm:$0xff]   ;;  %v726_v4 = vld [vmem:[%s931_s1 + $0x60] ss:$8 sps:$4 sm:$0xff]   ;;  %v727_v5 = vld [vmem:[%s931_s1 + $0x54] ss:$8 sps:$4 sm:$0xff]  }
   0xd   : > { %346 = vmatpush1.bf16.msra.mxu0 %v723_v1  ;;  %s642_s6 = sshll.u32 %s937_s22, 2  ;;  %v729_v6 = vld [vmem:[%s931_s1 + $0x50] ss:$8 sps:$4 sm:$0xff]   ;;  %v730_v7 = vld [vmem:[%s931_s1 + $0x44] ss:$8 sps:$4 sm:$0xff]   ;;  %v250_v35 = vshrl.u32 %v249_v34, 7 }
   0xe   : > { %347 = vmatprep.subr.bf16.mxu0 %v724_v3  ;;  %s838_s13 = scalar_lea.vmem %s930_s0, %s642_s6  ;;  %v732_v8 = vld [vmem:[%s931_s1 + $0x40] ss:$8 sps:$4 sm:$0xff]   ;;  %v733_v9 = vld [vmem:[%s931_s1 + $0x34] ss:$8 sps:$4 sm:$0xff]   ;;  %v735_v11 = vld [vmem:[%s931_s1 + $0x30] ss:$8 sps:$4 sm:$0xff]   ;;  %s226_s29 = scalar_lea.vmem %s935_s5, %s642_s6 }
   0xf   : > { %v746_v10 = vld [vmem:[%s933_s3 + $0x78] sm:$0xff]   ;;  %v736_v13 = vld [vmem:[%s931_s1 + $0x24] ss:$8 sps:$4 sm:$0xff]   ;;  %v748_v14 = vld [vmem:[%s933_s3 + $0x70] sm:$0xff]   ;;  %v255_v36 = vsub.s32 1, %v250_v35  ;;  %v251_v37 = vsub.s32 0, %v250_v35 }
  0x10   : > { %v747_v12 = vld [vmem:[%s933_s3 + $0x38] sm:$0xff]   ;;  %690 = vmatprep.subr.bf16.mxu1 %v746_v10  ;;  %v749_v15 = vld [vmem:[%s933_s3 + $0x30] sm:$0xff]   ;;  %v750_v16 = vld [vmem:[%s933_s3 + $0x68] sm:$0xff]  }
  0x11   : > { %348 = vmatpush1.bf16.msra.mxu0 %v726_v4  ;;  %691 = vmatpush3.bf16.msra.mxu1 %v747_v12  ;;  %v738_v17 = vld [vmem:[%s931_s1 + $0x20] ss:$8 sps:$4 sm:$0xff]   ;;  %v739_v18 = vld [vmem:[%s931_s1 + $0x14] ss:$8 sps:$4 sm:$0xff]   ;;  %v741_v21 = vld [vmem:[%s931_s1 + $0x10] ss:$8 sps:$4 sm:$0xff]  }
  0x12   : > { %349 = vmatprep.subr.bf16.mxu0 %v727_v5  ;;  %692 = vmatprep.subr.bf16.mxu1 %v748_v14  ;;  %v751_v19 = vld [vmem:[%s933_s3 + $0x28] sm:$0xff]   ;;  %v752_v20 = vld [vmem:[%s933_s3 + $0x60] sm:$0xff]   ;;  %v754_v24 = vld [vmem:[%s933_s3 + $0x58] sm:$0xff]  }
  0x13   : > { %v753_v22 = vld [vmem:[%s933_s3 + $0x20] sm:$0xff]   ;;  %v755_v26 = vld [vmem:[%s933_s3 + $0x18] sm:$0xff]   ;;  %v756_v28 = vld [vmem:[%s933_s3 + $0x50] sm:$0xff]  }
  0x14   : > { %v742_v23 = vld [vmem:[%s931_s1 + $0x4] ss:$8 sps:$4 sm:$0xff]   ;;  %v744_v25 = vld [vmem:[%s931_s1] ss:$8 sps:$4 sm:$0xff]   ;;  %v757_v29 = vld [vmem:[%s933_s3 + $0x10] sm:$0xff]  }
  0x15   : > { %350 = vmatpush1.bf16.msra.mxu0 %v729_v6  ;;  %693 = vmatpush3.bf16.msra.mxu1 %v749_v15  ;;  %v745_v27 = vld [vmem:[%s838_s13] sm:$0xff]   ;;  %v758_v30 = vld [vmem:[%s933_s3 + $0x48] sm:$0xff]  }
  0x16   : > { %351 = vmatprep.subr.bf16.mxu0 %v730_v7  ;;  %694 = vmatprep.subr.bf16.mxu1 %v750_v16  ;;  %v759_v31 = vld [vmem:[%s933_s3 + $0x8] sm:$0xff]   ;;  %v760_v32 = vld [vmem:[%s933_s3 + $0x40] sm:$0xff]  }
  0x17   : > { %v761_v33 = vld [vmem:[%s933_s3] sm:$0xff]  }
  0x18   : > { %v247_v38 = vld [vmem:[%s932_s2] sm:$0x3] }
  0x19   : > { %352 = vmatpush1.bf16.msra.mxu0 %v732_v8  ;;  %695 = vmatpush3.bf16.msra.mxu1 %v751_v19  ;;  %v256_v40 = vrot.slane %v247_v38, %v255_v36  ;;  %v252_v41 = vrot.slane %v247_v38, %v251_v37  ;;  %v662_v59 = vld [vmem:[%s934_s4] ss:$0 sm:$0xff] }
  0x1a   : > { %353 = vmatprep.subr.bf16.mxu0 %v733_v9  ;;  %696 = vmatprep.subr.bf16.mxu1 %v752_v20 }
  0x1d   : > { %354 = vmatpush1.bf16.msra.mxu0 %v735_v11  ;;  %697 = vmatpush3.bf16.msra.mxu1 %v753_v22 }
  0x1e   : > { %355 = vmatprep.subr.bf16.mxu0 %v736_v13  ;;  %698 = vmatprep.subr.bf16.mxu1 %v754_v24 }
  0x21   : > { %356 = vmatpush1.bf16.msra.mxu0 %v738_v17  ;;  %699 = vmatpush3.bf16.msra.mxu1 %v755_v26 }
  0x22   : > { %357 = vmatprep.subr.bf16.mxu0 %v739_v18  ;;  %700 = vmatprep.subr.bf16.mxu1 %v756_v28 }
  0x25   : > { %358 = vmatpush1.bf16.msra.mxu0 %v741_v21  ;;  %701 = vmatpush3.bf16.msra.mxu1 %v757_v29 }
  0x26   : > { %359 = vmatprep.subr.bf16.mxu0 %v742_v23  ;;  %702 = vmatprep.subr.bf16.mxu1 %v758_v30 }
  0x29   : > { %360 = vmatpush1.bf16.msra.mxu0 %v744_v25  ;;  %703 = vmatpush3.bf16.msra.mxu1 %v759_v31 }
  0x2a   : > { %704 = vmatprep.subr.bf16.mxu1 %v760_v32 }
  0x2c   : > { %378 = vmatmul.mubr.bf16.vlgmr.msra.gmra.mxu0 %v745_v27 }
  0x2d   : > { %705 = vmatpush3.bf16.msra.mxu1 %v761_v33 }
  0xec   : > { %v379_v39 = vpop.f32.mrf.mxu0 }
  0xed   : > { %v380_v46 = vadd.f32 %v379_v39, %v252_v41 }
  0xee   : > { %v381_v42 = vpop.f32.mrf.mxu0 }
  0xef   : > { %v382_v44 = vadd.f32 %v381_v42, %v256_v40  ;;  %v388_v52 = vmax.f32 %v380_v46, 0.0 }
  0xf0   : > { %v383_v43 = vpop.f32.mrf.mxu0 }
  0xf1   : > { %v384_v45 = vadd.f32 %v383_v43, %v252_v41  ;;  %v389_v50 = vmax.f32 %v382_v44, 0.0 }
  0xf2   : > { %v385_v47 = vpop.f32.mrf.mxu0 }
  0xf3   : > { %v386_v48 = vadd.f32 %v385_v47, %v256_v40  ;;  %v390_v49 = vmax.f32 %v384_v45, 0.0 }
  0xf5   : > { %v391_v51 = vmax.f32 %v386_v48, 0.0  ;;  %v392_v54 = vpack.c.bf16 %v390_v49, %v388_v52 }
  0xf7   : > { %v393_v53 = vpack.c.bf16 %v391_v51, %v389_v50 }
  0xf9   : > { %561 = vmatprep.mubr.bf16.mxu1 %v393_v53 }
  0xfa   : > { %562 = vmatmul.mubr.bf16.vlgmr.msra.gmra.mxu1 %v392_v54 }
 0x1ba   : > { %v706_v55 = vpop.f32.mrf.mxu1 }
 0x1bc   : > { %v707_v56 = vpop.f32.mrf.mxu1 }
 0x1bd   : > { %v708_v58 = vadd.f32 %v707_v56, %v706_v55 }
 0x1be   : > { %v709_v57 = vpop.f32.mrf.mxu1 }
 0x1bf   : > { %v564_v62 = vadd.f32 %v708_v58, %v662_v59 }
 0x1c0   : > { %v710_v60 = vpop.f32.mrf.mxu1 }
 0x1c1   : > { %v711_v61 = vadd.f32 %v710_v60, %v709_v57 }
 0x1c3   : > { %v567_v63 = vadd.f32 %v711_v61, %v662_v59 }
 0x1c5   : > { %v688_v0 = vpack.c.bf16 %v567_v63, %v564_v62 }
 0x1c7   : > { %689 = vst [vmem:[%s226_s29] sm:$0xff] %v688_v0  }
 0x1c8 PF: > { %s15_s18 = sadd.s32 1, %s768_s18  }
 0x1c9   : > { %p12_p4 = scmp.ge.s32.totalorder %s15_s18, 4  }
 0x1cb   :  { %14 = sbr.rel (!%p12_p4) target bundleno = 1 (0x1), region = 70 }

// kernel: docx_classifier_forward.3
= control target key start
LH: loop header
LB: loop body
LE: loop exit
PB: predicated region body
PF: predicated region fallthrough
CT: control target
= control target key end

     0   :  { %15 = vsyncpa [#allocation3], 0  ;;  %v954_v1 = vmov 0.0   ;;  %vm955_vm0 = vmmov 0   ;;  %s1196_s0 = inlined_call_operand.vmem [shape: bf16[2,128,128], index: 0, kind: input, shape index: {}]   ;;  %s1197_s1 = inlined_call_operand.vmem [shape: bf16[2,1,128], index: 1, kind: input, shape index: {}]   ;;  %s1198_s2 = inlined_call_operand.vmem [shape: bf16[128,128], index: 2, kind: input, shape index: {}]   ;;  %s1199_s3 = inlined_call_operand.vmem [shape: f32[1,128], index: 3, kind: input, shape index: {}]   ;;  %s1200_s4 = inlined_call_operand.vmem [shape: f32[1,128], index: 4, kind: input, shape index: {}]   ;;  %s1201_s5 = inlined_call_operand.vmem [shape: f32[1,128], index: 5, kind: input, shape index: {}]   ;;  %s1202_s6 = inlined_call_operand.vmem [shape: bf16[128,128], index: 6, kind: input, shape index: {}]   ;;  %s1203_s7 = inlined_call_operand.vmem [shape: f32[1,128], index: 7, kind: input, shape index: {}]   ;;  %s1204_s8 = inlined_call_operand.hbm [shape: f32[2,128], index: 8, kind: output, shape index: {0}]   ;;  %s1205_s9 = inlined_call_operand.hbm [shape: f32[2,128], index: 9, kind: output, shape index: {1}]  }
   0x1   :  { %v868_v0 = vld [vmem:[%s1196_s0 + $0x38] sm:$0xff]   ;;  %744 = vmatprep.subr.bf16.mxu0 %v954_v1  ;;  %764 = vmatprep.subr.bf16.mxu1 %v954_v1  ;;  %v870_v3 = vld [vmem:[%s1196_s0 + $0x30] sm:$0xff]   ;;  %v872_v5 = vld [vmem:[%s1196_s0 + $0x28] sm:$0xff]  }
   0x2   :  { %v869_v2 = vld [vmem:[%s1196_s0 + $0x78] sm:$0xff]   ;;  %745 = vmatpush3.bf16.xpose.msra.mxu0 %v868_v0  ;;  %760 = vmatprep.mubr.msk.bf16.mxu0 %vm955_vm0, %v954_v1  ;;  %v871_v4 = vld [vmem:[%s1196_s0 + $0x70] sm:$0xff]   ;;  %v873_v6 = vld [vmem:[%s1196_s0 + $0x68] sm:$0xff]  }
   0x3   :  { %765 = vmatpush3.bf16.xpose.msra.mxu1 %v869_v2  ;;  %746 = vmatprep.subr.bf16.mxu0 %v954_v1  ;;  %v874_v7 = vld [vmem:[%s1196_s0 + $0x20] sm:$0xff]  }
   0x4   :  { %766 = vmatprep.subr.bf16.mxu1 %v954_v1  ;;  %780 = vmatprep.mubr.msk.bf16.mxu1 %vm955_vm0, %v954_v1  ;;  %v875_v8 = vld [vmem:[%s1196_s0 + $0x60] sm:$0xff]  }
   0xa   :  { %747 = vmatpush3.bf16.xpose.msra.mxu0 %v870_v3 }
   0xb   :  { %767 = vmatpush3.bf16.xpose.msra.mxu1 %v871_v4  ;;  %748 = vmatprep.subr.bf16.mxu0 %v954_v1 }
   0xc   :  { %768 = vmatprep.subr.bf16.mxu1 %v954_v1 }
  0x12   :  { %749 = vmatpush3.bf16.xpose.msra.mxu0 %v872_v5 }
  0x13   :  { %769 = vmatpush3.bf16.xpose.msra.mxu1 %v873_v6  ;;  %750 = vmatprep.subr.bf16.mxu0 %v954_v1 }
  0x14   :  { %770 = vmatprep.subr.bf16.mxu1 %v954_v1 }
  0x1a   :  { %751 = vmatpush3.bf16.xpose.msra.mxu0 %v874_v7 }
  0x1b   :  { %771 = vmatpush3.bf16.xpose.msra.mxu1 %v875_v8  ;;  %752 = vmatprep.subr.bf16.mxu0 %v954_v1 }
  0x1c   :  { %16 = vsyncpa [#allocation5], 0  ;;  %772 = vmatprep.subr.bf16.mxu1 %v954_v1  ;;  %v876_v9 = vld [vmem:[%s1196_s0 + $0x18] sm:$0xff]   ;;  %v878_v11 = vld [vmem:[%s1196_s0 + $0x10] sm:$0xff]   ;;  %v244_v19 = vlaneseq  ;;  %vm249_vm2 = vcmask 1040384   ;;  %vm275_vm3 = vcmask 1041409  }
  0x1d   :  { %v877_v10 = vld [vmem:[%s1196_s0 + $0x58] sm:$0xff]   ;;  %v879_v12 = vld [vmem:[%s1196_s0 + $0x50] sm:$0xff]   ;;  %v880_v13 = vld [vmem:[%s1196_s0 + $0x8] sm:$0xff]   ;;  %vm482_vm4 = vcmask 1041408  }
  0x1e   :  { %v881_v14 = vld [vmem:[%s1196_s0 + $0x48] sm:$0xff]   ;;  %v882_v15 = vld [vmem:[%s1196_s0] sm:$0xff]   ;;  %v245_v20 = vand.u32 127, %v244_v19  ;;  %v884_v51 = vld [vmem:[%s1198_s2 + $0x38] sm:$0xff]  }
  0x1f   :  { %v883_v16 = vld [vmem:[%s1196_s0 + $0x40] sm:$0xff]   ;;  %v885_v54 = vld [vmem:[%s1198_s2 + $0x30] sm:$0xff]   ;;  %v886_v55 = vld [vmem:[%s1198_s2 + $0x28] sm:$0xff]  }
  0x20   :  { %v66_v17 = vld [vmem:[%s1197_s1] sm:$0x1]  ;;  %v67_v18 = vld [vmem:[%s1197_s1 + $0x1] sm:$0x1]  ;;  %vm246_vm1 = vcmp.lt.s32.totalorder %v245_v20, 16  ;;  %v888_v57 = vld [vmem:[%s1198_s2 + $0x18] sm:$0xff]  }
  0x21   :  { %v887_v56 = vld [vmem:[%s1198_s2 + $0x20] sm:$0xff]   ;;  %v889_v58 = vld [vmem:[%s1198_s2 + $0x10] sm:$0xff]   ;;  %v890_v59 = vld [vmem:[%s1198_s2 + $0x8] sm:$0xff]  }
  0x22   :  { %753 = vmatpush3.bf16.xpose.msra.mxu0 %v876_v9  ;;  %v891_v60 = vld [vmem:[%s1198_s2] sm:$0xff]   ;;  %v892_v20 = vld [vmem:[%s1202_s6 + $0x38] sm:$0xff]  }
  0x23   :  { %773 = vmatpush3.bf16.xpose.msra.mxu1 %v877_v10  ;;  %754 = vmatprep.subr.bf16.mxu0 %v954_v1 }
  0x24   :  { %774 = vmatprep.subr.bf16.mxu1 %v954_v1 }
  0x2a   :  { %755 = vmatpush3.bf16.xpose.msra.mxu0 %v878_v11 }
  0x2b   :  { %775 = vmatpush3.bf16.xpose.msra.mxu1 %v879_v12  ;;  %756 = vmatprep.subr.bf16.mxu0 %v954_v1 }
  0x2c   :  { %776 = vmatprep.subr.bf16.mxu1 %v954_v1 }
  0x32   :  { %757 = vmatpush3.bf16.xpose.msra.mxu0 %v880_v13 }
  0x33   :  { %777 = vmatpush3.bf16.xpose.msra.mxu1 %v881_v14  ;;  %758 = vmatprep.subr.bf16.mxu0 %v954_v1 }
  0x34   :  { %778 = vmatprep.subr.bf16.mxu1 %v954_v1 }
  0x3a   :  { %759 = vmatpush3.bf16.xpose.msra.mxu0 %v882_v15 }
  0x3b   :  { %779 = vmatpush3.bf16.xpose.msra.mxu1 %v883_v16  ;;  %784 = vmatprep.subr.bf16.mxu0 %v954_v1 }
  0x3c   :  { %804 = vmatprep.subr.bf16.mxu1 %v954_v1 }
  0x41   :  { %761 = vmatmul.mubr.bf16.vlgmr.msra.gmra.mxu0 %v66_v17 }
  0x42   :  { %781 = vmatmul.mubr.bf16.vlgmr.msra.gmra.mxu1 %v67_v18  ;;  %785 = vmatpush3.bf16.msra.mxu0 %v868_v0 }
  0x43   :  { %805 = vmatpush3.bf16.msra.mxu1 %v869_v2  ;;  %786 = vmatprep.subr.bf16.mxu0 %v954_v1 }
  0x44   :  { %806 = vmatprep.subr.bf16.mxu1 %v954_v1  ;;  %820 = vmatprep.mubr.msk.bf16.mxu1 %vm955_vm0, %v954_v1 }
  0x45   :  { %800 = vmatprep.mubr.msk.bf16.mxu0 %vm955_vm0, %v954_v1 }
  0x46   :  { %787 = vmatpush3.bf16.msra.mxu0 %v870_v3 }
  0x47   :  { %807 = vmatpush3.bf16.msra.mxu1 %v871_v4  ;;  %788 = vmatprep.subr.bf16.mxu0 %v954_v1 }
  0x48   :  { %808 = vmatprep.subr.bf16.mxu1 %v954_v1 }
  0x4a   :  { %789 = vmatpush3.bf16.msra.mxu0 %v872_v5 }
  0x4b   :  { %809 = vmatpush3.bf16.msra.mxu1 %v873_v6  ;;  %790 = vmatprep.subr.bf16.mxu0 %v954_v1 }
  0x4c   :  { %810 = vmatprep.subr.bf16.mxu1 %v954_v1 }
  0x4e   :  { %791 = vmatpush3.bf16.msra.mxu0 %v874_v7 }
  0x4f   :  { %811 = vmatpush3.bf16.msra.mxu1 %v875_v8  ;;  %792 = vmatprep.subr.bf16.mxu0 %v954_v1 }
  0x50   :  { %812 = vmatprep.subr.bf16.mxu1 %v954_v1 }
  0x52   :  { %793 = vmatpush3.bf16.msra.mxu0 %v876_v9 }
  0x53   :  { %813 = vmatpush3.bf16.msra.mxu1 %v877_v10  ;;  %794 = vmatprep.subr.bf16.mxu0 %v954_v1 }
  0x54   :  { %814 = vmatprep.subr.bf16.mxu1 %v954_v1 }
  0x56   :  { %795 = vmatpush3.bf16.msra.mxu0 %v878_v11 }
  0x57   :  { %815 = vmatpush3.bf16.msra.mxu1 %v879_v12  ;;  %796 = vmatprep.subr.bf16.mxu0 %v954_v1 }
  0x58   :  { %816 = vmatprep.subr.bf16.mxu1 %v954_v1 }
  0x5a   :  { %797 = vmatpush3.bf16.msra.mxu0 %v880_v13  ;;  %v670_v13 = vld [vmem:[%s1199_s3] ss:$0 sm:$0xff] }
  0x5b   :  { %817 = vmatpush3.bf16.msra.mxu1 %v881_v14  ;;  %798 = vmatprep.subr.bf16.mxu0 %v954_v1 }
  0x5c   :  { %818 = vmatprep.subr.bf16.mxu1 %v954_v1 }
  0x5e   :  { %799 = vmatpush3.bf16.msra.mxu0 %v882_v15 }
  0x5f   :  { %819 = vmatpush3.bf16.msra.mxu1 %v883_v16  ;;  %824 = vmatprep.subr.bf16.mxu0 %v954_v1 }
  0x60   :  { %844 = vmatprep.subr.bf16.mxu1 %v954_v1 }
 0x101   :  { %v150_v21 = vpop.f32.mrf.mxu0 }
 0x102   :  { %v238_v22 = vpop.f32.mrf.mxu1  ;;  %v247_v23 = vsel %vm246_vm1, %v150_v21, -1e+30  ;;  %v893_v21 = vld [vmem:[%s1202_s6 + $0x30] sm:$0xff]  }
 0x103   :  { %v248_v24 = vsel %vm246_vm1, %v238_v22, -1e+30  ;;  %v762_v25 = vpop.f32.mrf.mxu0  ;;  %v250_v30 = vsel %vm249_vm2, %v247_v23, -inf }
 0x104   :  { %v782_v26 = vpop.f32.mrf.mxu1  ;;  %v253_v27 = vsel %vm249_vm2, %v248_v24, -inf }
 0x105   :  { %254 = vmax.xlane.f32.xlu0 %v253_v27  ;;  %v153_v28 = vpop.f32.mrf.mxu0  ;;  %v894_v27 = vld [vmem:[%s1202_s6 + $0x28] sm:$0xff]  }
 0x106   :  { %v241_v29 = vpop.f32.mrf.mxu1  ;;  %v895_v28 = vld [vmem:[%s1202_s6 + $0x20] sm:$0xff]  }
 0x107   :  { %v763_v31 = vpop.f32.mrf.mxu0  ;;  %v896_v29 = vld [vmem:[%s1202_s6 + $0x18] sm:$0xff]  }
 0x108   :  { %v783_v32 = vpop.f32.mrf.mxu1  ;;  %v898_v31 = vld [vmem:[%s1202_s6 + $0x8] sm:$0xff]  }
 0x109   :  { %251 = vmax.xlane.f32.xlu0 %v250_v30  ;;  %v897_v30 = vld [vmem:[%s1202_s6 + $0x10] sm:$0xff]   ;;  %v899_v32 = vld [vmem:[%s1202_s6] sm:$0xff]   ;;  %s956_s6 = smov [#allocation4]  }
 0x10a   :  { %s642_s14 = sshll.u32 %s956_s6, 4  ;;  %s643_s14 = int_to_ptr.vmem [resolvable:$true] %s642_s14 }
 0x10b   :  { %s910_s15 = scalar_lea.vmem %s643_s14, 32  ;;  %p915_p1 = scmp.lt.s32.totalorder %s643_s14, %s643_s14 }
 0x10c   :  { %p911_p0 = scmp.ne.s32.totalorder %s643_s14, %s910_s15  ;;  %p916_p2 = scmp.lt.s32.totalorder %s910_s15, %s910_s15 }
 0x10e   :  { %p917_p3 = por %p916_p2, %p915_p1 }
 0x110   :  { %p918_p4 = pnand %p917_p3, %p911_p0 }
 0x18e   :  { %v255_v33 = vpop.xlane.xlu0 %254 }
 0x18f   :  { %v257_v34 = vsub.f32 %v248_v24, %v255_v33 }
 0x191   :  { %v260_v35 = vmul.f32 1.442695, %v257_v34 }
 0x192   :  { %v252_v36 = vpop.xlane.xlu0 %251 }
 0x193   :  { %900 = vpow2.f32 %v260_v35  ;;  %v256_v37 = vsub.f32 %v247_v23, %v252_v36 }
 0x195   :  { %v258_v38 = vmul.f32 1.442695, %v256_v37  ;;  %v679_v37 = vld [vmem:[%s1200_s4] ss:$0 sm:$0xff] }
 0x197   :  { %902 = vpow2.f32 %v258_v38 }
 0x1a0   :  { %v901_v39 = vpop.eup %900 }
 0x1a1   :  { %v265_v40 = vsel %vm249_vm2, %v901_v39, 0.0 }
 0x1a2   :  { %266 = vadd.xlane.f32.xlu1 %v265_v40 }
 0x1a4   :  { %v903_v41 = vpop.eup %902 }
 0x1a5   :  { %v262_v42 = vsel %vm249_vm2, %v903_v41, 0.0 }
 0x1a6   :  { %263 = vadd.xlane.f32.xlu1 %v262_v42 }
 0x22b   :  { %v267_v43 = vpop.xlane.xlu1 %266 }
 0x22c   :  { %904 = vrcp.f32 %v267_v43 }
 0x22f   :  { %v264_v44 = vpop.xlane.xlu1 %263 }
 0x230   :  { %906 = vrcp.f32 %v264_v44 }
 0x239   :  { %v905_v45 = vpop.eup %904 }
 0x23a   :  { %v271_v46 = vmul.f32 %v905_v45, %v901_v39  ;;  %v680_v39 = vld [vmem:[%s1201_s5] ss:$0 sm:$0xff] }
 0x23c   :  { %v280_v47 = vpack.c.bf16 %v271_v46, %v271_v46  ;;  %v274_v50 = vrot.slane %v271_v46, 7 }
 0x23d   :  { %v907_v48 = vpop.eup %906 }
 0x23e   :  { %821 = vmatmul.mubr.bf16.vlgmr.msra.gmra.mxu1 %v280_v47  ;;  %v269_v49 = vmul.f32 %v907_v48, %v903_v41 }
 0x23f   :  { %860 = vmatprep.mubr.msk.bf16.mxu1 %vm955_vm0, %v954_v1  ;;  %845 = vmatpush3.bf16.msra.mxu1 %v892_v20 }
 0x240   :  { %v279_v52 = vpack.c.bf16 %v269_v49, %v269_v49  ;;  %v276_v53 = vsel %vm275_vm3, %v274_v50, %v269_v49  ;;  %846 = vmatprep.subr.bf16.mxu1 %v954_v1 }
 0x241   :  { %278 = vst [vmem:[#allocation4] sm:$0x3] %v276_v53 }
 0x242   :  { %801 = vmatmul.mubr.bf16.vlgmr.msra.gmra.mxu0 %v279_v52 }
 0x243   :  { %825 = vmatpush3.bf16.msra.mxu0 %v884_v51  ;;  %840 = vmatprep.mubr.msk.bf16.mxu0 %vm955_vm0, %v954_v1 }
 0x244   :  { %826 = vmatprep.subr.bf16.mxu0 %v954_v1  ;;  %847 = vmatpush3.bf16.msra.mxu1 %v893_v21 }
 0x245   :  { %848 = vmatprep.subr.bf16.mxu1 %v954_v1 }
 0x247   :  { %827 = vmatpush3.bf16.msra.mxu0 %v885_v54 }
 0x248   :  { %828 = vmatprep.subr.bf16.mxu0 %v954_v1  ;;  %849 = vmatpush3.bf16.msra.mxu1 %v894_v27 }
 0x249   :  { %850 = vmatprep.subr.bf16.mxu1 %v954_v1 }
 0x24b   :  { %829 = vmatpush3.bf16.msra.mxu0 %v886_v55 }
 0x24c   :  { %830 = vmatprep.subr.bf16.mxu0 %v954_v1  ;;  %851 = vmatpush3.bf16.msra.mxu1 %v895_v28 }
 0x24d   :  { %852 = vmatprep.subr.bf16.mxu1 %v954_v1 }
 0x24f   :  { %831 = vmatpush3.bf16.msra.mxu0 %v887_v56 }
 0x250   :  { %832 = vmatprep.subr.bf16.mxu0 %v954_v1  ;;  %853 = vmatpush3.bf16.msra.mxu1 %v896_v29 }
 0x251   :  { %854 = vmatprep.subr.bf16.mxu1 %v954_v1 }
 0x253   :  { %833 = vmatpush3.bf16.msra.mxu0 %v888_v57 }
 0x254   :  { %834 = vmatprep.subr.bf16.mxu0 %v954_v1  ;;  %855 = vmatpush3.bf16.msra.mxu1 %v897_v30 }
 0x255   :  { %856 = vmatprep.subr.bf16.mxu1 %v954_v1 }
 0x257   :  { %835 = vmatpush3.bf16.msra.mxu0 %v889_v58 }
 0x258   :  { %836 = vmatprep.subr.bf16.mxu0 %v954_v1  ;;  %857 = vmatpush3.bf16.msra.mxu1 %v898_v31 }
 0x259   :  { %858 = vmatprep.subr.bf16.mxu1 %v954_v1 }
 0x25b   :  { %837 = vmatpush3.bf16.msra.mxu0 %v890_v59 }
 0x25c   :  { %838 = vmatprep.subr.bf16.mxu0 %v954_v1  ;;  %859 = vmatpush3.bf16.msra.mxu1 %v899_v32 }
 0x25f   :  { %839 = vmatpush3.bf16.msra.mxu0 %v891_v60 }
 0x2fe   :  { %v355_v61 = vpop.f32.mrf.mxu1 }
 0x2ff   :  { %v362_v62 = vpack.c.bf16 %v355_v61, %v355_v61 }
 0x300   :  { %v822_v63 = vpop.f32.mrf.mxu1 }
 0x301   :  { %v389_v0 = vunpack.c.l.b16 %v362_v62 }
 0x302   :  { %v315_v2 = vpop.f32.mrf.mxu0  ;;  %v358_v3 = vpop.f32.mrf.mxu1 }
 0x303   :  { %v361_v4 = vpack.c.bf16 %v315_v2, %v315_v2  ;;  %v390_v7 = vrot.slane %v389_v0, 7 }
 0x304   :  { %v802_v5 = vpop.f32.mrf.mxu0  ;;  %v823_v6 = vpop.f32.mrf.mxu1 }
 0x305   :  { %v388_v8 = vunpack.c.l.b16 %v361_v4 }
 0x306   :  { %v318_v9 = vpop.f32.mrf.mxu0 }
 0x307   :  { %v391_v10 = vsel %vm275_vm3, %v390_v7, %v388_v8 }
 0x308   :  { %v392_v11 = vpack.c.b16 %v391_v10, %v391_v10  ;;  %v803_v12 = vpop.f32.mrf.mxu0 }
 0x30a   :  { %841 = vmatmul.mubr.bf16.vlgmr.msra.gmra.mxu0 %v392_v11 }
 0x3ca   :  { %v476_v14 = vpop.f32.mrf.mxu0 }
 0x3cb   :  { %v477_v15 = vadd.f32 %v670_v13, %v476_v14 }
 0x3cc   :  { %v842_v16 = vpop.f32.mrf.mxu0 }
 0x3cd   :  { %v483_v17 = vsel %vm482_vm4, %v477_v15, 0.0 }
 0x3ce   :  { %484 = vadd.xlane.f32.xlu0 %v483_v17  ;;  %v479_v18 = vpop.f32.mrf.mxu0 }
 0x3d0   :  { %v843_v19 = vpop.f32.mrf.mxu0 }
 0x457   :  { %v485_v22 = vpop.xlane.xlu0 %484 }
 0x458   :  { %v487_v23 = vmul.f32 0.0078125, %v485_v22 }
 0x45a   :  { %v488_v24 = vsub.f32 %v477_v15, %v487_v23 }
 0x45c   :  { %v489_v25 = vmul.f32 %v488_v24, %v488_v24 }
 0x45e   :  { %v490_v26 = vsel %vm482_vm4, %v489_v25, 0.0 }
 0x45f   :  { %491 = vadd.xlane.f32.xlu1 %v490_v26 }
 0x4e8   :  { %v492_v33 = vpop.xlane.xlu1 %491 }
 0x4e9   :  { %v493_v34 = vmul.f32 0.0078125, %v492_v33 }
 0x4eb   :  { %v494_v35 = vadd.f32 1e-06, %v493_v34 }
 0x4ed   :  { %908 = vrsqrt.f32 %v494_v35 }
 0x4fa   :  { %v909_v36 = vpop.eup %908 }
 0x4fb   :  { %v496_v38 = vmul.f32 %v909_v36, %v488_v24 }
 0x4fd   :  { %v504_v40 = vmul.f32 %v679_v37, %v496_v38 }
 0x4ff   :  { %v512_v41 = vadd.f32 %v680_v39, %v504_v40 }
 0x501   :  { %v513_v42 = vpack.c.bf16 %v512_v41, %v512_v41 }
 0x503   :  { %861 = vmatmul.mubr.bf16.vlgmr.msra.gmra.mxu1 %v513_v42 }
 0x504   :  { %921 = shalt.err (!%p918_p4)
}
 0x505   :  { %645 = dma.vmem_to_hbm [thread:$0]  %s643_s14, 32, %s1205_s9, [#allocation5]   ;;  %v681_v1 = vld [vmem:[%s1203_s7] ss:$0 sm:$0xff] }
 0x506   :  { %s957_s2 = smov [#allocation2]  }
 0x507   :  { %s632_s18 = sshll.u32 %s957_s2, 4  ;;  %s633_s18 = int_to_ptr.vmem [resolvable:$true] %s632_s18 }
 0x508   :  { %s930_s19 = scalar_lea.vmem %s633_s18, 32  ;;  %p935_p6 = scmp.lt.s32.totalorder %s633_s18, %s633_s18 }
 0x509   :  { %p931_p5 = scmp.ne.s32.totalorder %s633_s18, %s930_s19  ;;  %p936_p7 = scmp.lt.s32.totalorder %s930_s19, %s930_s19 }
 0x50b   :  { %p937_p8 = por %p936_p7, %p935_p6 }
 0x50d   :  { %p938_p9 = pnand %p937_p8, %p931_p5 }
 0x5c3   :  { %v619_v43 = vpop.f32.mrf.mxu1 }
 0x5c4   :  { %v620_v44 = vadd.f32 %v681_v1, %v619_v43 }
 0x5c5   :  { %v862_v45 = vpop.f32.mrf.mxu1 }
 0x5c6   :  { %625 = vst [vmem:[#allocation2] sm:$0x3] %v620_v44 }
 0x5c7   :  { %v622_v46 = vpop.f32.mrf.mxu1 }
 0x5c8   :  { %941 = shalt.err (!%p938_p9)
}
 0x5c9   :  { %635 = dma.vmem_to_hbm [thread:$0]  %s633_s18, 32, %s1204_s8, [#allocation3]   ;;  %v863_v47 = vpop.f32.mrf.mxu1 }
 0x5ca   :  { %950 = dma.done.wait [#allocation3], 32  }
 0x5cb   :  { %951 = vsyncadd [#allocation3], 4294967264 }
 0x5cc   :  { %952 = dma.done.wait [#allocation5], 32  }
 0x5cd   :  { %953 = vsyncadd [#allocation5], 4294967264 }
 0x5ce   :  { %652 = vsyncpa [#allocation3], 1 }
 0x5cf   :  { %653 = vsyncpa [#allocation5], 1 }

</bundles_post_ra>
